<compile_context>
chip_gen: v7x
topology: tpu7x:2x2x1
jax: 0.10.0
libtpu: 0.0.40
codegen_flags: <defaults>
</compile_context>

<pallas_src>
import jax
import jax.numpy as jnp
from jax import lax
from jax.experimental import pallas as pl
from jax.experimental.pallas import tpu as pltpu

D = 30                          # fixed by the module (Linear in/out features)
_MAX_FT = 8192                  # lane-tile cap (VMEM guard, esp. v7x 64 MiB)
_MAX_BLOCK_BYTES = 4 << 20      # absolute per-buffer ceiling
_TARGET_BLOCK_BYTES = 2 << 20   # ~2 MiB x-block -> ~85%+ of HBM roofline


def _attention3d_kernel(x_ref, w_ref, b_ref, o_ref):
    # x_ref/o_ref: (Bt, 30, Ft)  native (batch, 30, features) layout, F on lanes
    # w_ref:       (30, 30)      PyTorch Linear weight (out, in)
    # b_ref:       (30, 1)       bias, broadcast across lanes
    w = w_ref[...]
    b = b_ref[...]

    def body(bi, carry):
        x = x_ref[bi]                                               # (30, Ft)
        logits = jnp.dot(w, x, preferred_element_type=jnp.float32)  # (30, Ft)
        logits = logits + b                                         # (30,1) bcast
        # numerically-stable softmax over the size-30 sublane axis (exact)
        m = jnp.max(logits, axis=0, keepdims=True)                  # (1, Ft)
        e = jnp.exp(logits - m)
        s = jnp.sum(e, axis=0, keepdims=True)                       # (1, Ft)
        probs = e / s                                               # exact division
        o_ref[bi] = (probs * x).astype(o_ref.dtype)
        return carry

    bt = x_ref.shape[0]
    if bt == 1:
        body(0, 0)
    else:
        # fori_loop (vs. a static Python unroll) bounds vreg live ranges.
        lax.fori_loop(0, bt, body, 0, unroll=True)


def _choose_tiles(B, F, itemsize):
    """Pick (bt, ft) sized by bytes: grow the lane tile (ft) toward
    ~_TARGET_BLOCK_BYTES first, then pack batch elements (bt, capped at 8)."""
    col_bytes = D * itemsize                          # bytes of one feature column
    budget_ft = max(128, (_TARGET_BLOCK_BYTES // col_bytes) // 128 * 128)

    if F % 128 == 0:
        ideal = min(F, _MAX_FT, budget_ft)
        # prefer a tile that divides F (no ragged tail) if it stays near the
        # ideal size; otherwise accept a partial last block (cdiv grid)
        ft = ideal
        while F % ft != 0:
            ft -= 128
        if ft * 4 < ideal * 3:
            ft = ideal
    elif F * col_bytes <= _MAX_BLOCK_BYTES:
        ft = F                                        # full extent (small / odd F)
    else:
        ft = min(_MAX_FT, budget_ft)                  # ragged 128-multiple tiles

    # pack batch elements only while the per-step block is still small
    block = col_bytes * ft
    bt = min(B, max(1, _TARGET_BLOCK_BYTES // block), 8)
    while B % bt != 0:
        bt -= 1

    # v7x has 2 TensorCores; "parallel" grid axes shard across them -> make
    # sure the grid has at least 2 steps whenever something can be split.
    if (B // bt) * pl.cdiv(F, ft) == 1:
        if bt > 1:
            bt = max(d for d in range(1, bt) if B % d == 0)
        elif F >= 256 and F % 256 == 0:
            ft = F // 2
        # else: single tiny block, nothing aligned to split -> leave as-is
    return bt, ft


def attention3d_block(inputs, weight, bias):
    """inputs: (B, 30, F); weight: (30, 30) PyTorch (out, in); bias: (30,)."""
    B, d, F = inputs.shape
    assert d == D
    itemsize = jnp.dtype(inputs.dtype).itemsize
    bt, ft = _choose_tiles(B, F, itemsize)
    grid = (B // bt, pl.cdiv(F, ft))

    weight = weight.astype(inputs.dtype)
    bias2 = bias.reshape(D, 1).astype(inputs.dtype)   # (30, 1): sublane-aligned

    cost = pl.CostEstimate(
        flops=2 * B * D * D * F + 5 * B * D * F,
        transcendentals=B * D * F,
        bytes_accessed=2 * B * D * F * itemsize + (D * D + D) * itemsize,
    )

    return pl.pallas_call(
        _attention3d_kernel,
        out_shape=jax.ShapeDtypeStruct((B, D, F), inputs.dtype),
        grid_spec=pltpu.PrefetchScalarGridSpec(
            num_scalar_prefetch=0,
            grid=grid,
            in_specs=[
                pl.BlockSpec((bt, D, ft), lambda i, j: (i, 0, j)),
                pl.BlockSpec((D, D), lambda i, j: (0, 0)),   # resident weight
                pl.BlockSpec((D, 1), lambda i, j: (0, 0)),   # resident bias
            ],
            out_specs=pl.BlockSpec((bt, D, ft), lambda i, j: (i, 0, j)),
        ),
        compiler_params=pltpu.CompilerParams(
            dimension_semantics=("parallel", "parallel"),
            vmem_limit_bytes=48 << 20,   # covers v5e's 16 MiB default; < v7x 64 MiB
        ),
        cost_estimate=cost,
    )(inputs, weight, bias2)


def _reference(inputs, weight, bias):
    x = jnp.transpose(inputs, (0, 2, 1))                   # (B, F, 30)
    y = jnp.einsum("bfd,od->bfo", x, weight,
                   precision=jax.lax.Precision.HIGHEST) + bias   # nn.Linear
    y = jax.nn.softmax(y, axis=2)
    return jnp.transpose(y, (0, 2, 1)) * inputs


if __name__ == "__main__":
    key = jax.random.PRNGKey(0)
    k1, k2, k3 = jax.random.split(key, 3)

    B, F = 2, 16
    inputs = jax.random.normal(k1, (B, D, F), dtype=jnp.float32)
    # deterministic synthetic parameters (PyTorch Linear-like init scale)
    bound = 1.0 / jnp.sqrt(D)
    weight = jax.random.uniform(k2, (D, D), jnp.float32, -bound, bound)
    bias = jax.random.uniform(k3, (D,), jnp.float32, -bound, bound)

    out = attention3d_block(inputs, weight, bias)
    out = jax.block_until_ready(out)

    ref = _reference(inputs, weight, bias)
    assert out.shape == (B, D, F)
    assert jnp.allclose(out, ref, atol=1e-4, rtol=1e-4), "mismatch vs reference"
    print("KERNEL_OK")
</pallas_src>

<mosaic_0001>
module attributes {stable_mosaic.version = 11 : i64} {
  func.func @_attention3d_kernel(%arg0: i32, %arg1: i32, %arg2: memref<1x30x16xf32, #tpu.memory_space<vmem>>, %arg3: memref<30x30xf32, #tpu.memory_space<vmem>>, %arg4: memref<30x1xf32, #tpu.memory_space<vmem>>, %arg5: memref<1x30x16xf32, #tpu.memory_space<vmem>>) attributes {dimension_semantics = [#tpu.dimension_semantics<parallel>, #tpu.dimension_semantics<parallel>], iteration_bounds = array<i64: 2, 1>, scalar_prefetch = 0 : i64, scratch_operands = 0 : i64, tpu.core_type = #tpu.core_type<tc>, window_params = [{transform_indices = @transform_0, window_bounds = array<i64: 1, 30, 16>}, {pipeline_mode = #tpu.pipeline_mode<synchronous>, transform_indices = @transform_1, window_bounds = array<i64: 30, 30>}, {pipeline_mode = #tpu.pipeline_mode<synchronous>, transform_indices = @transform_2, window_bounds = array<i64: 30, 1>}, {transform_indices = @transform_3, window_bounds = array<i64: 1, 30, 16>}]} {
    %c0 = arith.constant 0 : index
    %c0_0 = arith.constant 0 : index
    %0 = vector.load %arg3[%c0, %c0_0] : memref<30x30xf32, #tpu.memory_space<vmem>>, vector<30x30xf32>
    %c0_1 = arith.constant 0 : index
    %c0_2 = arith.constant 0 : index
    %1 = vector.load %arg4[%c0_1, %c0_2] : memref<30x1xf32, #tpu.memory_space<vmem>>, vector<30x1xf32>
    %c0_3 = arith.constant 0 : index
    %c0_4 = arith.constant 0 : index
    %c0_5 = arith.constant 0 : index
    %2 = vector.load %arg2[%c0_3, %c0_4, %c0_5] : memref<1x30x16xf32, #tpu.memory_space<vmem>>, vector<1x30x16xf32>
    %3 = vector.shape_cast %2 : vector<1x30x16xf32> to vector<30x16xf32>
    %cst = arith.constant dense<0.000000e+00> : vector<30x16xf32>
    %4 = tpu.matmul %0, %3, %cst {dimension_numbers = #tpu.dot_dimension_numbers<[1], [0], [0], [1], [0, 0, 1, 1], [], []>} : vector<30x30xf32>, vector<30x16xf32>, vector<30x16xf32> -> vector<30x16xf32>
    %5 = vector.broadcast %1 : vector<30x1xf32> to vector<30x16xf32>
    %6 = arith.addf %4, %5 : vector<30x16xf32>
    %cst_6 = arith.constant dense<0xFF800000> : vector<16xf32>
    %7 = vector.multi_reduction <maximumf>, %6, %cst_6 [0] : vector<30x16xf32> to vector<16xf32>
    %8 = vector.shape_cast %7 : vector<16xf32> to vector<1x16xf32>
    %9 = vector.broadcast %8 : vector<1x16xf32> to vector<30x16xf32>
    %10 = arith.subf %6, %9 : vector<30x16xf32>
    %11 = math.exp %10 : vector<30x16xf32>
    %cst_7 = arith.constant dense<0.000000e+00> : vector<16xf32>
    %12 = vector.multi_reduction <add>, %11, %cst_7 [0] : vector<30x16xf32> to vector<16xf32>
    %13 = vector.shape_cast %12 : vector<16xf32> to vector<1x16xf32>
    %14 = vector.broadcast %13 : vector<1x16xf32> to vector<30x16xf32>
    %15 = arith.divf %11, %14 : vector<30x16xf32>
    %16 = arith.mulf %15, %3 : vector<30x16xf32>
    %c0_8 = arith.constant 0 : index
    %c0_9 = arith.constant 0 : index
    %c0_10 = arith.constant 0 : index
    %17 = vector.load %arg5[%c0_8, %c0_9, %c0_10] : memref<1x30x16xf32, #tpu.memory_space<vmem>>, vector<1x30x16xf32>
    %18 = vector.shape_cast %17 : vector<1x30x16xf32> to vector<30x16xf32>
    %19 = vector.shape_cast %16 : vector<30x16xf32> to vector<1x30x16xf32>
    tpu.vector_store %arg5[%c0_8, %c0_9, %c0_10], %19 {strides = array<i32>} : memref<1x30x16xf32, #tpu.memory_space<vmem>>, vector<1x30x16xf32>,
    return
  }
  func.func @transform_0(%arg0: i32, %arg1: i32) -> (i32, i32, i32) {
    %c0_i32 = arith.constant 0 : i32
    %c0_i32_0 = arith.constant 0 : i32
    return %arg0, %c0_i32, %arg1 : i32, i32, i32
  }
  func.func @transform_1(%arg0: i32, %arg1: i32) -> (i32, i32) {
    %c0_i32 = arith.constant 0 : i32
    %c0_i32_0 = arith.constant 0 : i32
    %c0_i32_1 = arith.constant 0 : i32
    return %c0_i32, %c0_i32_0 : i32, i32
  }
  func.func @transform_2(%arg0: i32, %arg1: i32) -> (i32, i32) {
    %c0_i32 = arith.constant 0 : i32
    %c0_i32_0 = arith.constant 0 : i32
    %c0_i32_1 = arith.constant 0 : i32
    return %c0_i32, %c0_i32_0 : i32, i32
  }
  func.func @transform_3(%arg0: i32, %arg1: i32) -> (i32, i32, i32) {
    %c0_i32 = arith.constant 0 : i32
    %c0_i32_0 = arith.constant 0 : i32
    return %arg0, %c0_i32, %arg1 : i32, i32, i32
  }
}

</mosaic_0001>

<bundles_post_ra>
// kernel: tpu_custom_call.1
= control target key start
LH: loop header
LB: loop body
LE: loop exit
PB: predicated region body
PF: predicated region fallthrough
CT: control target
= control target key end

     0   :  { %s610_s12 = smov 0   ;;  %s612_s13 = smov 0   ;;  %s706_s0 = inlined_call_operand.vmem [shape: f32[2,30,16], index: 0, kind: input, shape index: {}]   ;;  %s707_s1 = inlined_call_operand.vmem [shape: f32[30,30], index: 1, kind: input, shape index: {}]   ;;  %s708_s2 = inlined_call_operand.vmem [shape: f32[30,1], index: 2, kind: input, shape index: {}]   ;;  %s709_s3 = inlined_call_operand.vmem [shape: f32[2,30,16], index: 3, kind: output, shape index: {}]  }
   0x1   :  { %s614_s14 = smov 0  }
   0x2 LB: > { %s25_s15 = sadd.s32 1, %s582_s13  ;;  %p476_p0 = scmp.ge.s32.totalorder %s586_s14, 1  ;;  %s586_s14 = sphi %s614_s14, %s13_s14   ;;  %s582_s13 = sphi %s612_s13, %s711_s13   ;;  %s578_s12 = sphi %s610_s12, %s710_s12  }
   0x3   : > { %p27_p1 = scmp.ge.s32.totalorder %s25_s15, 2  ;;  %p156_p2 = scmp.lt.s32.totalorder %s586_s14, 3 }
   0x5   : > { %s713_s15 = smov (%p27_p1, %s25_s15), 0  ;;  %p157_p3 = pnand %p476_p0, %p156_p2 }
   0x6   : > { %p186_p4 = scmp.lt.s32.totalorder (!%p157_p3), %s578_s12, 1  ;;  %v202_v0 = vld [vmem:[%s707_s1] sm:$0xff] (!%p157_p3)  ;;  %vm234_vm0 = vcmask (!%p157_p3), 244736   ;;  %v204_v1 = vld [vmem:[%s707_s1 + $0x10] sm:$0xff] (!%p157_p3)  ;;  %v588_v2 = vmov (!%p157_p3), 0   ;;  %v207_v6 = vld [vmem:[%s708_s2 + $0x8] sm:$0xff] (!%p157_p3) }
   0x7   : > { %160 = sbr.rel (%p157_p3) target bundleno = 313 (0x139), region = 32  ;;  %506 = vmatprep.mubr.msk.f32.mxu0 (!%p157_p3), %vm234_vm0, %v202_v0  ;;  %509 = vmatprep.mubr.msk.f32.mxu1 (!%p157_p3), %vm234_vm0, %v204_v1  ;;  %v208_v3 = vld [vmem:[%s708_s2 + $0x10] sm:$0xff] (!%p157_p3)  ;;  %v206_v4 = vld [vmem:[%s708_s2] sm:$0xff] (!%p157_p3)  ;;  %v209_v5 = vld [vmem:[%s708_s2 + $0x18] sm:$0x3f] (!%p157_p3)  ;;  %vm247_vm1 = vcmask (!%p157_p3), 1045504  }
   0x8   : > { %553 = vset.pattern.permute.xlu1 (!%p157_p3), %v588_v2  ;;  %552 = vset.pattern.permute.xlu0 (!%p157_p3), %v588_v2  ;;  %vm589_vm2 = vmmov (!%p157_p3), 1   ;;  %v203_v13 = vld [vmem:[%s707_s1 + $0x8] sm:$0xff] (!%p157_p3)  ;;  %v205_v14 = vld [vmem:[%s707_s1 + $0x18] sm:$0x3f] (!%p157_p3)  ;;  %vm336_vm4 = vcmask (!%p157_p3), 130048   ;;  %vm340_vm5 = vcmask (!%p157_p3), 128000  }
   0x9   : > { %226 = vperm.xlu1 (!%p157_p3), %553, %v208_v3   ;;  %216 = vperm.xlu0 (!%p157_p3), %552, %v206_v4   ;;  %vm517_vm3 = vmpackc.low (!%p157_p3), %vm247_vm1, %vm589_vm2 }
   0xd   : > { %231 = vperm.xlu1 (!%p157_p3), %553, %v209_v5   ;;  %221 = vperm.xlu0 (!%p157_p3), %552, %v207_v6  }
   0xe   : > { %s715_s12 = smov (!%p186_p4, %s578_s12), 1 }
   0xf   : > { %s488_s24 = sshll.u32 %s715_s12, 5 }
  0x10   : > { %s193_s4 = scalar_lea.vmem %s706_s0, %s488_s24  ;;  %s201_s11 = scalar_lea.vmem %s709_s3, %s488_s24 }
  0x11   : > { %v656_v7 = vld [vmem:[%s193_s4] sm:$0xff]  ;;  %v658_v8 = vld [vmem:[%s193_s4 + $0x8] sm:$0xff]  ;;  %v660_v9 = vld [vmem:[%s193_s4 + $0x10] sm:$0xff] }
  0x12   : > { %v512_v10 = vpack.c.bf16 %v658_v8, %v656_v7  ;;  %v664_v11 = vld [vmem:[%s193_s4 + $0x18] sm:$0x3f] }
  0x13   : > { %v516_v12 = vpack.c.bf16 %v664_v11, %v660_v9 }
  0x14   : > { %513 = vmatprep.subr.bf16.mxu0 %v512_v10  ;;  %522 = vmatprep.subr.bf16.mxu1 %v512_v10 }
  0x15   : > { %515 = vmatpush3.bf16.msra.mxu0 %v512_v10  ;;  %524 = vmatpush3.bf16.msra.mxu1 %v512_v10 }
  0x16   : > { %518 = vmatprep.subr.msk.bf16.mxu0 %vm517_vm3, %v516_v12  ;;  %523 = vmatprep.subr.msk.bf16.mxu1 %vm517_vm3, %v516_v12 }
  0x19   : > { %521 = vmatpush3.bf16.msk.msra.mxu0 %vm517_vm3, %v516_v12  ;;  %525 = vmatpush3.bf16.msk.msra.mxu1 %vm517_vm3, %v516_v12 }
  0x1c   : > { %507 = vmatmul.mubr.msk.f32.vlgmr.msra.gmra.mrb[0].mxu0 %vm234_vm0, %v203_v13  ;;  %510 = vmatmul.mubr.msk.f32.vlgmr.msra.gmra.mrb[0].mxu1 %vm234_vm0, %v205_v14 }
  0x88   : > { %v227_v15 = vpop.permute.xlu1 %226  ;;  %v217_v16 = vpop.permute.xlu0 %216 }
  0x8c   : > { %v232_v17 = vpop.permute.xlu1 %231  ;;  %v222_v18 = vpop.permute.xlu0 %221 }
  0xef   : > { %v508_v19 = vpop.f32.mrb[0].mxu0  ;;  %v511_v20 = vpop.f32.mrb[0].mxu1 }
  0xf0   : > { %v323_v21 = vadd.f32 %v508_v19, %v222_v18  ;;  %v333_v22 = vadd.f32 %v511_v20, %v232_v17  ;;  %v317_v23 = vpop.f32.mrb[1].mxu0  ;;  %v327_v24 = vpop.f32.mrb[1].mxu1 }
  0xf1   : > { %v318_v25 = vadd.f32 %v317_v23, %v217_v16  ;;  %v328_v26 = vadd.f32 %v327_v24, %v227_v15 }
  0xf2   : > { %v338_v27 = vsel %vm336_vm4, %v323_v21, -inf  ;;  %v341_v28 = vsel %vm340_vm5, %v333_v22, -inf }
  0xf3   : > { %v337_v29 = vsel %vm336_vm4, %v318_v25, -inf  ;;  %v339_v30 = vsel %vm336_vm4, %v328_v26, -inf }
  0xf4   : > { %v342_v31 = vmax.f32 %v337_v29, %v338_v27  ;;  %v343_v32 = vmax.f32 %v339_v30, %v341_v28 }
  0xf6   : > { %v344_v33 = vmax.f32 %v342_v31, %v343_v32 }
  0xf8   : > { %v345_v34 = vrot.slane %v344_v33, 4 }
  0xfa   : > { %v346_v35 = vmax.f32 %v344_v33, %v345_v34 }
  0xfc   : > { %v347_v36 = vrot.slane %v346_v35, 2 }
  0xfe   : > { %v348_v37 = vmax.f32 %v346_v35, %v347_v36 }
 0x100   : > { %v349_v38 = vrot.slane %v348_v37, 1 }
 0x102   : > { %v350_v39 = vmax.f32 %v348_v37, %v349_v38 }
 0x104   : > { %v351_v40 = vsub.f32 %v318_v25, %v350_v39  ;;  %v352_v41 = vsub.f32 %v323_v21, %v350_v39  ;;  %v353_v42 = vsub.f32 %v328_v26, %v350_v39  ;;  %v354_v43 = vsub.f32 %v333_v22, %v350_v39 }
 0x106   : > { %v355_v44 = vmul.f32 1.442695, %v351_v40  ;;  %v357_v45 = vmul.f32 1.442695, %v352_v41  ;;  %v359_v46 = vmul.f32 1.442695, %v353_v42 }
 0x107   : > { %v361_v47 = vmul.f32 1.442695, %v354_v43 }
 0x108   : > { %554 = vpow2.f32 %v355_v44 }
 0x109   : > { %556 = vpow2.f32 %v357_v45 }
 0x10a   : > { %558 = vpow2.f32 %v359_v46 }
 0x10b   : > { %560 = vpow2.f32 %v361_v47 }
 0x112   : > { %v555_v48 = vpop.eup %554 }
 0x113   : > { %v557_v49 = vpop.eup %556  ;;  %v363_v50 = vsel %vm336_vm4, %v555_v48, 0.0 }
 0x114   : > { %v559_v51 = vpop.eup %558  ;;  %v364_v52 = vsel %vm336_vm4, %v557_v49, 0.0 }
 0x115   : > { %v561_v53 = vpop.eup %560  ;;  %v365_v54 = vadd.f32 %v364_v52, %v363_v50  ;;  %v366_v55 = vsel %vm336_vm4, %v559_v51, 0.0 }
 0x116   : > { %v368_v57 = vsel %vm340_vm5, %v561_v53, 0.0 }
 0x117   : > { %v367_v56 = vadd.f32 %v366_v55, %v365_v54 }
 0x119   : > { %v369_v58 = vadd.f32 %v368_v57, %v367_v56 }
 0x11b   : > { %v370_v59 = vrot.slane %v369_v58, 4 }
 0x11d   : > { %v371_v60 = vadd.f32 %v370_v59, %v369_v58 }
 0x11f   : > { %v372_v61 = vrot.slane %v371_v60, 2 }
 0x121   : > { %v373_v62 = vadd.f32 %v372_v61, %v371_v60 }
 0x123   : > { %v374_v63 = vrot.slane %v373_v62, 1 }
 0x125   : > { %v375_v0 = vadd.f32 %v374_v63, %v373_v62 }
 0x127   : > { %562 = vrcp.f32 %v375_v0 }
 0x131   : > { %v563_v1 = vpop.eup %562 }
 0x132   : > { %v377_v2 = vmul.f32 %v563_v1, %v555_v48  ;;  %v378_v3 = vmul.f32 %v563_v1, %v557_v49  ;;  %v379_v4 = vmul.f32 %v563_v1, %v559_v51  ;;  %v380_v5 = vmul.f32 %v563_v1, %v561_v53 }
 0x134   : > { %v381_v6 = vmul.f32 %v377_v2, %v656_v7  ;;  %v382_v10 = vmul.f32 %v378_v3, %v658_v8  ;;  %v383_v12 = vmul.f32 %v379_v4, %v660_v9  ;;  %v384_v13 = vmul.f32 %v380_v5, %v664_v11 }
 0x136   : > { %385 = vst.msk [vmem:[%s201_s11] sm:$0xff] %vm336_vm4, %v381_v6  ;;  %386 = vst.msk [vmem:[%s201_s11 + $0x8] sm:$0xff] %vm336_vm4, %v382_v10 }
 0x137   : > { %387 = vst.msk [vmem:[%s201_s11 + $0x10] sm:$0xff] %vm336_vm4, %v383_v12 }
 0x138   : > { %388 = vst.msk [vmem:[%s201_s11 + $0x18] sm:$0x3f] %vm340_vm5, %v384_v13 }
 0x139 PF: > { %s13_s14 = sadd.s32 1, %s586_s14   ;;  %s710_s12 = smov %s582_s13 }
 0x13a   : > { %p10_p5 = scmp.ge.s32.totalorder %s13_s14, 4   ;;  %s711_s13 = smov %s713_s15 }
 0x13c   :  { %12 = sbr.rel (!%p10_p5) target bundleno = 2 (0x2), region = 62 }

</bundles_post_ra>
